<compile_context>
chip_gen: v7x
topology: tpu7x:2x2x1
jax: 0.10.0
libtpu: 0.0.40
codegen_flags: <defaults>
</compile_context>

<pallas_src>
import jax
import jax.numpy as jnp
from jax.experimental import pallas as pl
from jax.experimental.pallas import tpu as pltpu


def _round_up(x, m):
    return ((x + m - 1) // m) * m


def _round_down(x, m):
    return (x // m) * m


def _choose_time_chunk(T_pad):
    """Chunk size for streaming the T axis; T_pad is always a 128 multiple."""
    for tt in (512, 256, 128):
        if T_pad % tt == 0:
            return tt
    return 128  # unreachable


def _vmem_plan(B, T_pad, H):
    """Pick the batch tile TB and an explicit scoped-VMEM limit.

    Accounts for every double-buffered block per grid step:
      x (TB*T_pad*H) + att out (TB*T_pad) + rep out (TB*H) + lengths (TB*1),
    all f32/i32 and x2 buffers, plus the (1, H) weight.
    """
    try:
        cap = int(pltpu.get_tpu_info().vmem_capacity_bytes)
    except Exception:
        cap = 64 * 1024 * 1024  # v7x per-TC size: conservative on every gen

    # Double-buffered plan budget: ~48 MiB on v7x (64 MiB/TC),
    # capped at ~56 MiB on v5e/v6e (128 MiB physical VMEM).
    plan_budget = min(56 * 2**20, (cap * 3) // 4)

    per_row = 2 * 4 * (T_pad * H + T_pad + H + 1)  # bytes per batch row / step

    if B <= 8:
        # Tiny batch: a multiple-of-8 sub-tile is not a legal block shape for
        # the 2-D outputs, so the full batch is the only clean tile.
        tb = B
    else:
        # Fit the budget, but also target ~4 grid steps (never fewer than 2)
        # so DMA prefetch overlap and v7x megacore sharding engage.
        tb = min(max(1, plan_budget // per_row), _round_up(pl.cdiv(B, 4), 8))
        tb = max(8, _round_down(tb, 8))
    # NOTE: for extremely large T_pad*H (per_row*8 > VMEM) a second grid axis
    # over T would be required; not needed for LSTM-pool-attention shapes.

    footprint = tb * per_row + 2 * 4 * H + (1 << 20)
    vmem_limit = int(min(cap, footprint + (16 << 20)))
    return tb, vmem_limit


def _make_attention_kernel(TT):
    def attention_kernel(x_ref, w_ref, len_ref, rep_ref, att_ref):
        # x_ref   : (TB, T_pad, H) f32   VMEM block
        # w_ref   : (1, H)         f32   att_weights (same block every step)
        # len_ref : (TB, 1)        i32
        # rep_ref : (TB, H)        f32   out
        # att_ref : (TB, T_pad)    f32   out (also used as staging scratch)
        TB, T, H = x_ref.shape
        n_chunks = T // TT
        unroll = True if n_chunks <= 8 else 4   # partial unroll for long T

        w = w_ref[...]        # (1, H)
        lens = len_ref[...]   # (TB, 1)

        # ---- pass 1: s = relu(<x[b,t,:], w>) per chunk -> att_ref ----------
        # carry: running per-row max (relu scores are >= 0, so 0 is a floor).
        def score_body(c, m_run):
            t0 = pl.multiple_of(c * TT, TT)
            xc = x_ref[:, pl.ds(t0, TT), :]                      # (TB, TT, H)
            sc = jnp.maximum(jnp.sum(xc * w, axis=-1), 0.0)      # (TB, TT)
            att_ref[:, pl.ds(t0, TT)] = sc
            return jnp.maximum(m_run, jnp.max(sc, axis=-1, keepdims=True))

        m0 = jnp.zeros((TB, 1), jnp.float32)
        m = jax.lax.fori_loop(0, n_chunks, score_body, m0, unroll=unroll)

        # ---- pass 2: masked exponentials -> att_ref; carry the row sum -----
        # softmax followed by the post-mask renormalization collapses to a
        # single normalization:
        #     attn = exp(s - m) * mask / sum(exp(s - m) * mask)
        def exp_body(c, den):
            t0 = pl.multiple_of(c * TT, TT)
            sc = att_ref[:, pl.ds(t0, TT)]                       # raw scores
            pos = t0 + jax.lax.broadcasted_iota(jnp.int32, (TB, TT), 1)
            me = jnp.where(pos < lens, jnp.exp(sc - m), 0.0)     # (TB, TT)
            att_ref[:, pl.ds(t0, TT)] = me
            return den + jnp.sum(me, axis=-1, keepdims=True)

        d0 = jnp.zeros((TB, 1), jnp.float32)
        denom = jax.lax.fori_loop(0, n_chunks, exp_body, d0, unroll=unroll)
        # One divide per row, broadcast-multiply below (exact, keeps 1e-5 tol).
        # Matches the reference's NaN behavior if lengths[b] == 0.
        inv = 1.0 / denom                                        # (TB, 1)

        # ---- pass 3: normalize attn and rep[b,h] = sum_t attn[b,t]*x[b,t,h] -
        def rep_body(c, acc):
            t0 = pl.multiple_of(c * TT, TT)
            ac = att_ref[:, pl.ds(t0, TT)] * inv                 # (TB, TT)
            att_ref[:, pl.ds(t0, TT)] = ac
            xc = x_ref[:, pl.ds(t0, TT), :]                      # (TB, TT, H)
            return acc + jnp.sum(xc * ac[:, :, None], axis=1)    # (TB, H)

        acc0 = jnp.zeros((TB, H), jnp.float32)
        rep_ref[...] = jax.lax.fori_loop(0, n_chunks, rep_body, acc0,
                                         unroll=unroll)

    return attention_kernel


def attention_forward(inputs, att_weights, lengths):
    """inputs: (B, T, H) f32, att_weights: (1, H) f32, lengths: (B,) int."""
    B, T, H = inputs.shape
    lengths_2d = lengths.astype(jnp.int32).reshape(B, 1)

    # Pad T to a multiple of 128 so the (TB, T) attention blocks are lane-dense
    # (full-width stores). The length mask zeroes the padded columns, so the
    # result is unchanged; the padded tail of `att` is sliced off below.
    T_pad = _round_up(T, 128)
    x = inputs
    if T_pad != T:
        x = jnp.pad(inputs, ((0, 0), (0, T_pad - T), (0, 0)))

    TB, vmem_limit = _vmem_plan(B, T_pad, H)
    TT = _choose_time_chunk(T_pad)
    grid = (pl.cdiv(B, TB),)

    rep, att = pl.pallas_call(
        _make_attention_kernel(TT),
        out_shape=(
            jax.ShapeDtypeStruct((B, H), jnp.float32),      # representations
            jax.ShapeDtypeStruct((B, T_pad), jnp.float32),  # attentions (padded)
        ),
        grid=grid,
        in_specs=[
            pl.BlockSpec((TB, T_pad, H), lambda i: (i, 0, 0)),
            pl.BlockSpec((1, H), lambda i: (0, 0)),
            pl.BlockSpec((TB, 1), lambda i: (i, 0)),
        ],
        out_specs=(
            pl.BlockSpec((TB, H), lambda i: (i, 0)),
            pl.BlockSpec((TB, T_pad), lambda i: (i, 0)),
        ),
        compiler_params=pltpu.CompilerParams(
            dimension_semantics=("parallel",),   # megacore on v7x
            vmem_limit_bytes=vmem_limit,         # explicit, plan-sized limit
        ),
    )(x, att_weights, lengths_2d)
    return rep, att[:, :T]


def attention_reference(inputs, att_weights, lengths):
    """Pure-JAX reference mirroring the PyTorch forward exactly."""
    B, T, H = inputs.shape
    scores = jnp.einsum("bth,h->bt", inputs, att_weights[0])
    attn = jax.nn.softmax(jax.nn.relu(scores), axis=-1)
    pos = jnp.arange(T)[None, :]
    mask = (pos < lengths[:, None]).astype(jnp.float32)
    masked = attn * mask
    attn_n = masked / jnp.sum(masked, axis=-1, keepdims=True)
    rep = jnp.sum(inputs * attn_n[:, :, None], axis=1)
    return rep, attn_n


if __name__ == "__main__":
    B, T, H = 2, 8, 32
    key = jax.random.PRNGKey(0)
    k_x, k_w = jax.random.split(key)

    inputs = jax.random.normal(k_x, (B, T, H), dtype=jnp.float32)

    # nn.init.uniform_(att_weights, -stdv, stdv) with stdv = 1/sqrt(hidden_size)
    stdv = 1.0 / jnp.sqrt(jnp.float32(H))
    att_weights = jax.random.uniform(
        k_w, (1, H), minval=-stdv, maxval=stdv, dtype=jnp.float32)

    lengths = jnp.array([8, 5], dtype=jnp.int32)

    rep, att = attention_forward(inputs, att_weights, lengths)
    rep = jax.block_until_ready(rep)
    att = jax.block_until_ready(att)

    rep_ref, att_ref = attention_reference(inputs, att_weights, lengths)
    assert jnp.allclose(rep, rep_ref, atol=1e-5, rtol=1e-5)
    assert jnp.allclose(att, att_ref, atol=1e-5, rtol=1e-5)

    print("KERNEL_OK")
</pallas_src>

<mosaic_0001>
module attributes {stable_mosaic.version = 11 : i64} {
  func.func @attention_kernel(%arg0: i32, %arg1: memref<2x128x32xf32, #tpu.memory_space<vmem>>, %arg2: memref<1x32xf32, #tpu.memory_space<vmem>>, %arg3: memref<2x1xi32, #tpu.memory_space<vmem>>, %arg4: memref<2x32xf32, #tpu.memory_space<vmem>>, %arg5: memref<2x128xf32, #tpu.memory_space<vmem>>) attributes {dimension_semantics = [#tpu.dimension_semantics<parallel>], iteration_bounds = array<i64: 1>, scalar_prefetch = 0 : i64, scratch_operands = 0 : i64, tpu.core_type = #tpu.core_type<tc>, window_params = [{transform_indices = @transform_0, window_bounds = array<i64: 2, 128, 32>}, {pipeline_mode = #tpu.pipeline_mode<synchronous>, transform_indices = @transform_1, window_bounds = array<i64: 1, 32>}, {transform_indices = @transform_2, window_bounds = array<i64: 2, 1>}, {transform_indices = @transform_3, window_bounds = array<i64: 2, 32>}, {transform_indices = @transform_4, window_bounds = array<i64: 2, 128>}]} {
    %c0 = arith.constant 0 : index
    %c0_0 = arith.constant 0 : index
    %0 = vector.load %arg2[%c0, %c0_0] : memref<1x32xf32, #tpu.memory_space<vmem>>, vector<1x32xf32>
    %c0_1 = arith.constant 0 : index
    %c0_2 = arith.constant 0 : index
    %1 = vector.load %arg3[%c0_1, %c0_2] : memref<2x1xi32, #tpu.memory_space<vmem>>, vector<2x1xi32>
    %cst = arith.constant 0.000000e+00 : f32
    %2 = vector.broadcast %cst : f32 to vector<2x1xf32>
    %c0_i32 = arith.constant 0 : i32
    %c128_i32 = arith.constant 128 : i32
    %3 = arith.muli %c0_i32, %c128_i32 : i32
    %4 = tpu.assume_multiple %3, 128 : i32
    %c0_3 = arith.constant 0 : index
    %5 = arith.index_cast %4 : i32 to index
    %c0_4 = arith.constant 0 : index
    %6 = vector.load %arg1[%c0_3, %5, %c0_4] : memref<2x128x32xf32, #tpu.memory_space<vmem>>, vector<2x128x32xf32>
    %7 = vector.shape_cast %0 : vector<1x32xf32> to vector<1x1x32xf32>
    %8 = vector.broadcast %7 : vector<1x1x32xf32> to vector<2x128x32xf32>
    %9 = arith.mulf %6, %8 : vector<2x128x32xf32>
    %cst_5 = arith.constant dense<0.000000e+00> : vector<2x128xf32>
    %10 = vector.multi_reduction <add>, %9, %cst_5 [2] : vector<2x128x32xf32> to vector<2x128xf32>
    %cst_6 = arith.constant 0.000000e+00 : f32
    %11 = vector.broadcast %cst_6 : f32 to vector<2x128xf32>
    %12 = arith.maximumf %10, %11 : vector<2x128xf32>
    %c0_7 = arith.constant 0 : index
    %13 = arith.index_cast %4 : i32 to index
    %14 = vector.load %arg5[%c0_7, %13] : memref<2x128xf32, #tpu.memory_space<vmem>>, vector<2x128xf32>
    tpu.vector_store %arg5[%c0_7, %13], %12 {strides = array<i32>} : memref<2x128xf32, #tpu.memory_space<vmem>>, vector<2x128xf32>,
    %cst_8 = arith.constant dense<0xFF800000> : vector<2xf32>
    %15 = vector.multi_reduction <maximumf>, %12, %cst_8 [1] : vector<2x128xf32> to vector<2xf32>
    %16 = vector.shape_cast %15 : vector<2xf32> to vector<2x1xf32>
    %17 = arith.maximumf %2, %16 : vector<2x1xf32>
    %c1_i32 = arith.constant 1 : i32
    %cst_9 = arith.constant 0.000000e+00 : f32
    %18 = vector.broadcast %cst_9 : f32 to vector<2x1xf32>
    %c0_i32_10 = arith.constant 0 : i32
    %c128_i32_11 = arith.constant 128 : i32
    %19 = arith.muli %c0_i32_10, %c128_i32_11 : i32
    %20 = tpu.assume_multiple %19, 128 : i32
    %c0_12 = arith.constant 0 : index
    %21 = arith.index_cast %20 : i32 to index
    %22 = vector.load %arg5[%c0_12, %21] : memref<2x128xf32, #tpu.memory_space<vmem>>, vector<2x128xf32>
    %23 = tpu.iota {dimensions = array<i32: 1>} : vector<2x128xi32>
    %24 = vector.broadcast %20 : i32 to vector<2x128xi32>
    %25 = arith.addi %24, %23 : vector<2x128xi32>
    %26 = vector.broadcast %1 : vector<2x1xi32> to vector<2x128xi32>
    %27 = arith.cmpi slt, %25, %26 : vector<2x128xi32>
    %28 = vector.broadcast %17 : vector<2x1xf32> to vector<2x128xf32>
    %29 = arith.subf %22, %28 : vector<2x128xf32>
    %30 = math.exp %29 : vector<2x128xf32>
    %cst_13 = arith.constant 0.000000e+00 : f32
    %31 = vector.broadcast %cst_13 : f32 to vector<2x128xf32>
    %32 = arith.select %27, %30, %31 : vector<2x128xi1>, vector<2x128xf32>
    %c0_14 = arith.constant 0 : index
    %33 = arith.index_cast %20 : i32 to index
    %34 = vector.load %arg5[%c0_14, %33] : memref<2x128xf32, #tpu.memory_space<vmem>>, vector<2x128xf32>
    tpu.vector_store %arg5[%c0_14, %33], %32 {strides = array<i32>} : memref<2x128xf32, #tpu.memory_space<vmem>>, vector<2x128xf32>,
    %cst_15 = arith.constant dense<0.000000e+00> : vector<2xf32>
    %35 = vector.multi_reduction <add>, %32, %cst_15 [1] : vector<2x128xf32> to vector<2xf32>
    %36 = vector.shape_cast %35 : vector<2xf32> to vector<2x1xf32>
    %37 = arith.addf %18, %36 : vector<2x1xf32>
    %c1_i32_16 = arith.constant 1 : i32
    %cst_17 = arith.constant 1.000000e+00 : f32
    %38 = vector.broadcast %cst_17 : f32 to vector<2x1xf32>
    %39 = arith.divf %38, %37 : vector<2x1xf32>
    %cst_18 = arith.constant 0.000000e+00 : f32
    %40 = vector.broadcast %cst_18 : f32 to vector<2x32xf32>
    %c0_i32_19 = arith.constant 0 : i32
    %c128_i32_20 = arith.constant 128 : i32
    %41 = arith.muli %c0_i32_19, %c128_i32_20 : i32
    %42 = tpu.assume_multiple %41, 128 : i32
    %c0_21 = arith.constant 0 : index
    %43 = arith.index_cast %42 : i32 to index
    %44 = vector.load %arg5[%c0_21, %43] : memref<2x128xf32, #tpu.memory_space<vmem>>, vector<2x128xf32>
    %45 = vector.broadcast %39 : vector<2x1xf32> to vector<2x128xf32>
    %46 = arith.mulf %44, %45 : vector<2x128xf32>
    %c0_22 = arith.constant 0 : index
    %47 = arith.index_cast %42 : i32 to index
    %48 = vector.load %arg5[%c0_22, %47] : memref<2x128xf32, #tpu.memory_space<vmem>>, vector<2x128xf32>
    tpu.vector_store %arg5[%c0_22, %47], %46 {strides = array<i32>} : memref<2x128xf32, #tpu.memory_space<vmem>>, vector<2x128xf32>,
    %c0_23 = arith.constant 0 : index
    %49 = arith.index_cast %42 : i32 to index
    %c0_24 = arith.constant 0 : index
    %50 = vector.load %arg1[%c0_23, %49, %c0_24] : memref<2x128x32xf32, #tpu.memory_space<vmem>>, vector<2x128x32xf32>
    %51 = vector.shape_cast %46 : vector<2x128xf32> to vector<2x128x1xf32>
    %52 = vector.broadcast %51 : vector<2x128x1xf32> to vector<2x128x32xf32>
    %53 = arith.mulf %50, %52 : vector<2x128x32xf32>
    %cst_25 = arith.constant dense<0.000000e+00> : vector<2x32xf32>
    %54 = vector.multi_reduction <add>, %53, %cst_25 [1] : vector<2x128x32xf32> to vector<2x32xf32>
    %55 = arith.addf %40, %54 : vector<2x32xf32>
    %c1_i32_26 = arith.constant 1 : i32
    %c0_27 = arith.constant 0 : index
    %c0_28 = arith.constant 0 : index
    %56 = vector.load %arg4[%c0_27, %c0_28] : memref<2x32xf32, #tpu.memory_space<vmem>>, vector<2x32xf32>
    tpu.vector_store %arg4[%c0_27, %c0_28], %55 {strides = array<i32>} : memref<2x32xf32, #tpu.memory_space<vmem>>, vector<2x32xf32>,
    return
  }
  func.func @transform_0(%arg0: i32) -> (i32, i32, i32) {
    %c0_i32 = arith.constant 0 : i32
    %c0_i32_0 = arith.constant 0 : i32
    %c0_i32_1 = arith.constant 0 : i32
    return %arg0, %c0_i32, %c0_i32_0 : i32, i32, i32
  }
  func.func @transform_1(%arg0: i32) -> (i32, i32) {
    %c0_i32 = arith.constant 0 : i32
    %c0_i32_0 = arith.constant 0 : i32
    %c0_i32_1 = arith.constant 0 : i32
    return %c0_i32, %c0_i32_0 : i32, i32
  }
  func.func @transform_2(%arg0: i32) -> (i32, i32) {
    %c0_i32 = arith.constant 0 : i32
    %c0_i32_0 = arith.constant 0 : i32
    return %arg0, %c0_i32 : i32, i32
  }
  func.func @transform_3(%arg0: i32) -> (i32, i32) {
    %c0_i32 = arith.constant 0 : i32
    %c0_i32_0 = arith.constant 0 : i32
    return %arg0, %c0_i32 : i32, i32
  }
  func.func @transform_4(%arg0: i32) -> (i32, i32) {
    %c0_i32 = arith.constant 0 : i32
    %c0_i32_0 = arith.constant 0 : i32
    return %arg0, %c0_i32 : i32, i32
  }
}

</mosaic_0001>

<bundles_post_ra>
// kernel: tpu_custom_call.1
= control target key start
LH: loop header
LB: loop body
LE: loop exit
PB: predicated region body
PF: predicated region fallthrough
CT: control target
= control target key end

     0   :  { %10 = vsyncpa [#allocation3], 0  ;;  %vm90_vm0 = vcmask 261120   ;;  %s1396_s0 = inlined_call_operand.vmem [shape: f32[2,128,32], index: 0, kind: input, shape index: {}]   ;;  %s1397_s1 = inlined_call_operand.vmem [shape: f32[1,32], index: 1, kind: input, shape index: {}]   ;;  %s1398_s2 = inlined_call_operand.vmem [shape: s32[2,1], index: 2, kind: input, shape index: {}]   ;;  %s1399_s3 = inlined_call_operand.hbm [shape: f32[2,32], index: 3, kind: output, shape index: {0}]   ;;  %s1400_s4 = inlined_call_operand.hbm [shape: f32[2,128], index: 4, kind: output, shape index: {1}]  }
   0x1   :  { %v868_v0 = vld [vmem:[%s1397_s1] ss:$0 sm:$0xff]  ;;  %v887_v5 = vld [vmem:[%s1396_s0 + $0x88] sm:$0xff]  ;;  %v901_v9 = vld [vmem:[%s1396_s0 + $0x90] sm:$0xff] }
   0x2   :  { %v873_v1 = vld [vmem:[%s1396_s0 + $0x80] sm:$0xff]  ;;  %v892_v6 = vld [vmem:[%s1396_s0 + $0x8] sm:$0xff]  ;;  %v75_v7 = vmul.f32 %v868_v0, %v887_v5  ;;  %v906_v10 = vld [vmem:[%s1396_s0 + $0x10] sm:$0xff]  ;;  %v76_v15 = vmul.f32 %v868_v0, %v901_v9 }
   0x3   :  { %v878_v2 = vld [vmem:[%s1396_s0] sm:$0xff]  ;;  %v74_v3 = vmul.f32 %v868_v0, %v873_v1  ;;  %v59_v8 = vmul.f32 %v868_v0, %v892_v6  ;;  %v60_v16 = vmul.f32 %v868_v0, %v906_v10  ;;  %v919_v17 = vld [vmem:[%s1396_s0 + $0x98] sm:$0xff] }
   0x4   :  { %v58_v4 = vmul.f32 %v868_v0, %v878_v2  ;;  %v142_v13 = vsel %vm90_vm0, %v75_v7, 0.0  ;;  %v924_v18 = vld [vmem:[%s1396_s0 + $0x18] sm:$0xff]  ;;  %v145_v19 = vsel %vm90_vm0, %v76_v15, 0.0  ;;  %v77_v21 = vmul.f32 %v868_v0, %v919_v17  ;;  %v935_v23 = vld [vmem:[%s1396_s0 + $0xa0] sm:$0xff] }
   0x5   :  { %v139_v11 = vsel %vm90_vm0, %v74_v3, 0.0  ;;  %v94_v14 = vsel %vm90_vm0, %v59_v8, 0.0  ;;  %1423 = vst [vmem:[#allocation8_spill] sm:$0xff] %v924_v18  ;;  %v97_v20 = vsel %vm90_vm0, %v60_v16, 0.0  ;;  %v61_v22 = vmul.f32 %v868_v0, %v924_v18  ;;  %v940_v24 = vld [vmem:[%s1396_s0 + $0x20] sm:$0xff] }
   0x6   :  { %v91_v12 = vsel %vm90_vm0, %v58_v4, 0.0  ;;  %140 = vadd.xlane.f32.xlu1 %v139_v11  ;;  %1424 = vst [vmem:[#allocation9_spill] sm:$0xff] %v940_v24 }
   0x7   :  { %92 = vadd.xlane.f32.xlu0 %v91_v12 }
   0xa   :  { %143 = vadd.xlane.f32.xlu1 %v142_v13 }
   0xb   :  { %95 = vadd.xlane.f32.xlu0 %v94_v14 }
   0xc   :  { %11 = vsyncpa [#allocation5], 0  ;;  %v148_v25 = vsel %vm90_vm0, %v77_v21, 0.0  ;;  %v100_v26 = vsel %vm90_vm0, %v61_v22, 0.0  ;;  %v78_v27 = vmul.f32 %v868_v0, %v935_v23  ;;  %v62_v28 = vmul.f32 %v868_v0, %v940_v24  ;;  %v951_v29 = vld [vmem:[%s1396_s0 + $0xa8] sm:$0xff]  ;;  %v967_v35 = vld [vmem:[%s1396_s0 + $0xb0] sm:$0xff] }
   0xd   :  { %v956_v30 = vld [vmem:[%s1396_s0 + $0x28] sm:$0xff]  ;;  %v79_v33 = vmul.f32 %v868_v0, %v951_v29  ;;  %v972_v36 = vld [vmem:[%s1396_s0 + $0x30] sm:$0xff]  ;;  %v80_v39 = vmul.f32 %v868_v0, %v967_v35  ;;  %v983_v41 = vld [vmem:[%s1396_s0 + $0xb8] sm:$0xff]  ;;  %vm262_vm1 = vcmask 130112   ;;  %vm269_vm2 = vcmask 195712  }
   0xe   :  { %146 = vadd.xlane.f32.xlu1 %v145_v19  ;;  %1425 = vst [vmem:[#allocation10_spill] sm:$0xff] %v956_v30  ;;  %v151_v31 = vsel %vm90_vm0, %v78_v27, 0.0  ;;  %v103_v32 = vsel %vm90_vm0, %v62_v28, 0.0  ;;  %v63_v34 = vmul.f32 %v868_v0, %v956_v30  ;;  %1426 = vst [vmem:[#allocation11_spill] sm:$0xff] %v972_v36  ;;  %v64_v40 = vmul.f32 %v868_v0, %v972_v36  ;;  %v988_v42 = vld [vmem:[%s1396_s0 + $0x38] sm:$0xff]  ;;  %v999_v47 = vld [vmem:[%s1396_s0 + $0xc0] sm:$0xff] }
   0xf   :  { %98 = vadd.xlane.f32.xlu0 %v97_v20  ;;  %v154_v37 = vsel %vm90_vm0, %v79_v33, 0.0  ;;  %1427 = vst [vmem:[#allocation12_spill] sm:$0xff] %v983_v41  ;;  %1428 = vst [vmem:[#allocation13_spill] sm:$0xff] %v988_v42  ;;  %v157_v43 = vsel %vm90_vm0, %v80_v39, 0.0  ;;  %v81_v45 = vmul.f32 %v868_v0, %v983_v41  ;;  %v65_v46 = vmul.f32 %v868_v0, %v988_v42  ;;  %v1004_v48 = vld [vmem:[%s1396_s0 + $0x40] sm:$0xff]  ;;  %v1015_v53 = vld [vmem:[%s1396_s0 + $0xc8] sm:$0xff] }
  0x10   :  { %v106_v38 = vsel %vm90_vm0, %v63_v34, 0.0  ;;  %v109_v44 = vsel %vm90_vm0, %v64_v40, 0.0  ;;  %1429 = vst [vmem:[#allocation14_spill] sm:$0xff] %v999_v47  ;;  %1430 = vst [vmem:[#allocation15_spill] sm:$0xff] %v1004_v48  ;;  %v82_v51 = vmul.f32 %v868_v0, %v999_v47  ;;  %v66_v52 = vmul.f32 %v868_v0, %v1004_v48  ;;  %v1020_v54 = vld [vmem:[%s1396_s0 + $0x48] sm:$0xff]  ;;  %v1031_v59 = vld [vmem:[%s1396_s0 + $0xd0] sm:$0xff] }
  0x11   :  { %v160_v49 = vsel %vm90_vm0, %v81_v45, 0.0  ;;  %v112_v50 = vsel %vm90_vm0, %v65_v46, 0.0  ;;  %1431 = vst [vmem:[#allocation16_spill] sm:$0xff] %v1015_v53  ;;  %1432 = vst [vmem:[#allocation17_spill] sm:$0xff] %v1020_v54  ;;  %v83_v57 = vmul.f32 %v868_v0, %v1015_v53  ;;  %v67_v58 = vmul.f32 %v868_v0, %v1020_v54  ;;  %v1036_v60 = vld [vmem:[%s1396_s0 + $0x50] sm:$0xff]  ;;  %v1047_v4 = vld [vmem:[%s1396_s0 + $0xd8] sm:$0xff] }
  0x12   :  { %149 = vadd.xlane.f32.xlu1 %v148_v25  ;;  %v163_v55 = vsel %vm90_vm0, %v82_v51, 0.0  ;;  %v115_v56 = vsel %vm90_vm0, %v66_v52, 0.0  ;;  %1433 = vst [vmem:[#allocation18_spill] sm:$0xff] %v1031_v59  ;;  %1434 = vst [vmem:[#allocation19_spill] sm:$0xff] %v1036_v60  ;;  %v84_v63 = vmul.f32 %v868_v0, %v1031_v59  ;;  %v68_v3 = vmul.f32 %v868_v0, %v1036_v60  ;;  %v1052_v7 = vld [vmem:[%s1396_s0 + $0x58] sm:$0xff]  ;;  %v1063_v14 = vld [vmem:[%s1396_s0 + $0xe0] sm:$0xff] }
  0x13   :  { %101 = vadd.xlane.f32.xlu0 %v100_v26  ;;  %v166_v61 = vsel %vm90_vm0, %v83_v57, 0.0  ;;  %v118_v62 = vsel %vm90_vm0, %v67_v58, 0.0  ;;  %1435 = vst [vmem:[#allocation20_spill] sm:$0xff] %v1047_v4  ;;  %1436 = vst [vmem:[#allocation21_spill] sm:$0xff] %v1052_v7  ;;  %v85_v12 = vmul.f32 %v868_v0, %v1047_v4  ;;  %v69_v13 = vmul.f32 %v868_v0, %v1052_v7  ;;  %v1068_v15 = vld [vmem:[%s1396_s0 + $0x60] sm:$0xff]  ;;  %v1079_v22 = vld [vmem:[%s1396_s0 + $0xe8] sm:$0xff] }
  0x14   :  { %v169_v8 = vsel %vm90_vm0, %v84_v63, 0.0  ;;  %v121_v11 = vsel %vm90_vm0, %v68_v3, 0.0  ;;  %1437 = vst [vmem:[#allocation22_spill] sm:$0xff] %v1063_v14  ;;  %1438 = vst [vmem:[#allocation23_spill] sm:$0xff] %v1068_v15  ;;  %v86_v20 = vmul.f32 %v868_v0, %v1063_v14  ;;  %v70_v21 = vmul.f32 %v868_v0, %v1068_v15  ;;  %v1084_v25 = vld [vmem:[%s1396_s0 + $0x68] sm:$0xff]  ;;  %v1100_v33 = vld [vmem:[%s1396_s0 + $0x70] sm:$0xff] }
  0x15   :  { %v172_v16 = vsel %vm90_vm0, %v85_v12, 0.0  ;;  %v124_v19 = vsel %vm90_vm0, %v69_v13, 0.0  ;;  %1439 = vst [vmem:[#allocation24_spill] sm:$0xff] %v1079_v22  ;;  %1440 = vst [vmem:[#allocation25_spill] sm:$0xff] %v1084_v25  ;;  %v87_v28 = vmul.f32 %v868_v0, %v1079_v22  ;;  %v72_v39 = vmul.f32 %v868_v0, %v1100_v33  ;;  %v1111_v40 = vld [vmem:[%s1396_s0 + $0xf8] sm:$0xff] }
  0x16   :  { %152 = vadd.xlane.f32.xlu1 %v151_v31  ;;  %v175_v26 = vsel %vm90_vm0, %v86_v20, 0.0  ;;  %v127_v27 = vsel %vm90_vm0, %v70_v21, 0.0  ;;  %v71_v31 = vmul.f32 %v868_v0, %v1084_v25  ;;  %1442 = vst [vmem:[#allocation27_spill] sm:$0xff] %v1100_v33  ;;  %1443 = vst [vmem:[#allocation28_spill] sm:$0xff] %v1111_v40  ;;  %v89_v46 = vmul.f32 %v868_v0, %v1111_v40  ;;  %v19_v52 = vld [vmem:[%s1398_s2] sm:$0x3] }
  0x17   :  { %104 = vadd.xlane.f32.xlu0 %v103_v32  ;;  %v1095_v32 = vld [vmem:[%s1396_s0 + $0xf0] sm:$0xff]  ;;  %v178_v34 = vsel %vm90_vm0, %v87_v28, 0.0  ;;  %v133_v45 = vsel %vm90_vm0, %v72_v39, 0.0  ;;  %v251_v20 = vlaneseq  ;;  %vm276_vm3 = vcmask 261312   ;;  %s838_s2 = smov [#allocation4]  }
  0x18   :  { %1441 = vst [vmem:[#allocation26_spill] sm:$0xff] %v1095_v32  ;;  %vm283_vm4 = vcmask 326912   ;;  %vm290_vm5 = vcmask 392512   ;;  %vm297_vm6 = vcmask 458112   ;;  %vm304_vm7 = vcmask 523712   ;;  %s767_s27 = sshll.u32 %s838_s2, 4  ;;  %s768_s27 = int_to_ptr.vmem [resolvable:$true] %s767_s27 }
  0x19   :  { %v1163_v28 = vshrl.u32 %v251_v20, 7  ;;  %vm311_vm8 = vcmask 589312   ;;  %vm318_vm9 = vcmask 654912   ;;  %vm325_vm10 = vcmask 720512   ;;  %s789_s28 = scalar_lea.vmem %s768_s27, 32  ;;  %p794_p1 = scmp.lt.s32.totalorder %s768_s27, %s768_s27 }
  0x1a   :  { %155 = vadd.xlane.f32.xlu1 %v154_v37  ;;  %v130_v37 = vsel %vm90_vm0, %v71_v31, 0.0  ;;  %vm332_vm11 = vcmask 786112   ;;  %vm339_vm12 = vcmask 851712   ;;  %vm346_vm13 = vcmask 917312   ;;  %p790_p0 = scmp.ne.s32.totalorder %s768_s27, %s789_s28  ;;  %p795_p2 = scmp.lt.s32.totalorder %s789_s28, %s789_s28 }
  0x1b   :  { %107 = vadd.xlane.f32.xlu0 %v106_v38  ;;  %v88_v38 = vmul.f32 %v868_v0, %v1095_v32  ;;  %vm353_vm14 = vcmask 982912   ;;  %vm360_vm15 = vcmask 1048512  }
  0x1c   :  { %p796_p3 = por %p795_p2, %p794_p1 }
  0x1e   :  { %158 = vadd.xlane.f32.xlu1 %v157_v43  ;;  %v1116_v43 = vld [vmem:[%s1396_s0 + $0x78] sm:$0xff]  ;;  %p797_p4 = pnand %p796_p3, %p790_p0 }
  0x1f   :  { %110 = vadd.xlane.f32.xlu0 %v109_v44  ;;  %1444 = vst [vmem:[#allocation29_spill] sm:$0xff] %v1116_v43  ;;  %v181_v44 = vsel %vm90_vm0, %v88_v38, 0.0 }
  0x22   :  { %161 = vadd.xlane.f32.xlu1 %v160_v49  ;;  %v73_v49 = vmul.f32 %v868_v0, %v1116_v43 }
  0x23   :  { %113 = vadd.xlane.f32.xlu0 %v112_v50  ;;  %v184_v50 = vsel %vm90_vm0, %v89_v46, 0.0 }
  0x24   :  { %v136_v51 = vsel %vm90_vm0, %v73_v49, 0.0 }
  0x26   :  { %164 = vadd.xlane.f32.xlu1 %v163_v55  ;;  %v837_v55 = vmov 0  }
  0x27   :  { %116 = vadd.xlane.f32.xlu0 %v115_v56  ;;  %783 = vset.pattern.permute.xlu1 %v837_v55 }
  0x28   :  { %784 = vset.pattern.permute.xlu0 %v837_v55 }
  0x2a   :  { %167 = vadd.xlane.f32.xlu1 %v166_v61 }
  0x2b   :  { %119 = vadd.xlane.f32.xlu0 %v118_v62 }
  0x2e   :  { %170 = vadd.xlane.f32.xlu1 %v169_v8 }
  0x2f   :  { %122 = vadd.xlane.f32.xlu0 %v121_v11 }
  0x32   :  { %173 = vadd.xlane.f32.xlu1 %v172_v16 }
  0x33   :  { %125 = vadd.xlane.f32.xlu0 %v124_v19 }
  0x36   :  { %176 = vadd.xlane.f32.xlu1 %v175_v26 }
  0x37   :  { %128 = vadd.xlane.f32.xlu0 %v127_v27  ;;  %v1161_v27 = vand.u32 127, %v251_v20 }
  0x39   :  { %v257_v31 = vadd.s32 4294967288, %v1161_v27  ;;  %v292_v46 = vadd.s32 4294967248, %v1161_v27  ;;  %v299_v49 = vadd.s32 4294967240, %v1161_v27  ;;  %v320_v55 = vadd.s32 4294967216, %v1161_v27 }
  0x3a   :  { %179 = vadd.xlane.f32.xlu1 %v178_v34  ;;  %v264_v34 = vadd.s32 4294967280, %v1161_v27  ;;  %v327_v20 = vadd.s32 4294967208, %v1161_v27  ;;  %v334_v60 = vadd.s32 4294967200, %v1161_v27  ;;  %v341_v22 = vadd.s32 4294967192, %v1161_v27 }
  0x3b   :  { %131 = vadd.xlane.f32.xlu0 %v130_v37  ;;  %v271_v37 = vadd.s32 4294967272, %v1161_v27  ;;  %v260_v43 = vsub.s32 %v257_v31, %v1163_v28  ;;  %v295_v31 = vsub.s32 %v292_v46, %v1163_v28  ;;  %v1206_v14 = vsub.s32 %v320_v55, %v1163_v28 }
  0x3c   :  { %v267_v33 = vsub.s32 %v264_v34, %v1163_v28  ;;  %v1195_v34 = vsub.s32 %v299_v49, %v1163_v28  ;;  %v1209_v48 = vsub.s32 %v327_v20, %v1163_v28  ;;  %v1222_v20 = vsub.s32 %v334_v60, %v1163_v28 }
  0x3d   :  { %v274_v40 = vsub.s32 %v271_v37, %v1163_v28  ;;  %v355_v42 = vadd.s32 4294967176, %v1161_v27 }
  0x3e   :  { %182 = vadd.xlane.f32.xlu1 %v181_v44  ;;  %v278_v44 = vadd.s32 4294967264, %v1161_v27 }
  0x3f   :  { %134 = vadd.xlane.f32.xlu0 %v133_v45  ;;  %v285_v45 = vadd.s32 4294967256, %v1161_v27 }
  0x40   :  { %v281_v32 = vsub.s32 %v278_v44, %v1163_v28 }
  0x41   :  { %v288_v7 = vsub.s32 %v285_v45, %v1163_v28 }
  0x42   :  { %185 = vadd.xlane.f32.xlu1 %v184_v50  ;;  %v306_v50 = vadd.s32 4294967232, %v1161_v27 }
  0x43   :  { %137 = vadd.xlane.f32.xlu0 %v136_v51  ;;  %v313_v51 = vadd.s32 4294967224, %v1161_v27 }
  0x44   :  { %v1198_v37 = vsub.s32 %v306_v50, %v1163_v28 }
  0x45   :  { %v1201_v54 = vsub.s32 %v313_v51, %v1163_v28 }
  0x53   :  { %454 = vperm.xlu1 %783, %v19_v52   ;;  %v255_v52 = vsub.s32 %v1161_v27, %v1163_v28 }
  0x93   :  { %v1129_v56 = vpop.xlane.xlu1 %140 }
  0x94   :  { %v1131_v57 = vpop.xlane.xlu0 %92  ;;  %v203_v46 = vmax.f32 %v1129_v56, 0.0  ;;  %v1225_v56 = vsub.s32 %v341_v22, %v1163_v28 }
  0x95   :  { %v187_v49 = vmax.f32 %v1131_v57, 0.0 }
  0x96   :  { %v365_v60 = vrot.slane %v203_v46, %v255_v52 }
  0x97   :  { %v1133_v0 = vpop.xlane.xlu1 %143  ;;  %v256_v53 = vrot.slane %v187_v49, %v255_v52 }
  0x98   :  { %v1135_v58 = vpop.xlane.xlu0 %95  ;;  %v204_v44 = vmax.f32 %v1133_v0, 0.0 }
  0x99   :  { %v188_v45 = vmax.f32 %v1135_v58, 0.0 }
  0x9a   :  { %v369_v59 = vrot.slane %v204_v44, %v260_v43 }
  0x9b   :  { %v1137_v61 = vpop.xlane.xlu1 %146  ;;  %v261_v36 = vrot.slane %v188_v45, %v260_v43 }
  0x9c   :  { %v1139_v62 = vpop.xlane.xlu0 %98  ;;  %v205_v50 = vmax.f32 %v1137_v61, 0.0 }
  0x9d   :  { %v189_v51 = vmax.f32 %v1139_v62, 0.0  ;;  %v348_v62 = vadd.s32 4294967184, %v1161_v27  ;;  %v263_v52 = vsel %vm262_vm1, %v261_v36, %v256_v53 }
  0x9e   :  { %v374_v30 = vrot.slane %v205_v50, %v267_v33 }
  0x9f   :  { %v1141_v63 = vpop.xlane.xlu1 %149  ;;  %v268_v22 = vrot.slane %v189_v51, %v267_v33  ;;  %v370_v33 = vsel %vm262_vm1, %v369_v59, %v365_v60  ;;  %vm441_vm1 = vcmask 1041409  }
  0xa0   :  { %v1143_v3 = vpop.xlane.xlu0 %101  ;;  %v206_v58 = vmax.f32 %v1141_v63, 0.0 }
  0xa1   :  { %v190_v55 = vmax.f32 %v1143_v3, 0.0 }
  0xa3   :  { %v1145_v8 = vpop.xlane.xlu1 %152  ;;  %v275_v24 = vrot.slane %v190_v55, %v274_v40 }
  0xa4   :  { %v1147_v11 = vpop.xlane.xlu0 %104  ;;  %v207_v57 = vmax.f32 %v1145_v8, 0.0 }
  0xa5   :  { %v191_v61 = vmax.f32 %v1147_v11, 0.0  ;;  %v379_v11 = vrot.slane %v206_v58, %v274_v40  ;;  %v375_v40 = vsel %vm269_vm2, %v374_v30, %v370_v33 }
  0xa6   :  { %v384_v43 = vrot.slane %v207_v57, %v281_v32 }
  0xa7   :  { %v1149_v12 = vpop.xlane.xlu1 %155  ;;  %v282_v44 = vrot.slane %v191_v61, %v281_v32 }
  0xa8   :  { %v1151_v13 = vpop.xlane.xlu0 %107  ;;  %v208_v63 = vmax.f32 %v1149_v12, 0.0  ;;  %v1240_v12 = vsub.s32 %v348_v62, %v1163_v28 }
  0xa9   :  { %v192_v3 = vmax.f32 %v1151_v13, 0.0  ;;  %v1243_v13 = vsub.s32 %v355_v42, %v1163_v28  ;;  %v380_v42 = vsel %vm276_vm3, %v379_v11, %v375_v40 }
  0xaa   :  { %v389_v45 = vrot.slane %v208_v63, %v288_v7  ;;  %v385_v53 = vsel %vm283_vm4, %v384_v43, %v380_v42 }
  0xab   :  { %v1153_v16 = vpop.xlane.xlu1 %158  ;;  %v289_v46 = vrot.slane %v192_v3, %v288_v7 }
  0xac   :  { %v1155_v19 = vpop.xlane.xlu0 %110  ;;  %v209_v41 = vmax.f32 %v1153_v16, 0.0  ;;  %v270_v16 = vsel %vm269_vm2, %v268_v22, %v263_v52  ;;  %vm445_vm2 = vcmask 1041408  }
  0xad   :  { %v193_v18 = vmax.f32 %v1155_v19, 0.0  ;;  %v277_v59 = vsel %vm276_vm3, %v275_v24, %v270_v16 }
  0xae   :  { %v394_v51 = vrot.slane %v209_v41, %v295_v31  ;;  %v284_v30 = vsel %vm283_vm4, %v282_v44, %v277_v59 }
  0xaf   :  { %v1157_v21 = vpop.xlane.xlu1 %161  ;;  %v296_v36 = vrot.slane %v193_v18, %v295_v31  ;;  %v291_v58 = vsel %vm290_vm5, %v289_v46, %v284_v30 }
  0xb0   :  { %v1159_v26 = vpop.xlane.xlu0 %113  ;;  %v210_v19 = vmax.f32 %v1157_v21, 0.0 }
  0xb1   :  { %v194_v32 = vmax.f32 %v1159_v26, 0.0  ;;  %v390_v26 = vsel %vm290_vm5, %v389_v45, %v385_v53  ;;  %v298_v62 = vsel %vm297_vm6, %v296_v36, %v291_v58 }
  0xb2   :  { %v399_v18 = vrot.slane %v210_v19, %v1195_v34  ;;  %v395_v61 = vsel %vm297_vm6, %v394_v51, %v390_v26 }
  0xb3   :  { %v1168_v38 = vpop.xlane.xlu1 %164  ;;  %v303_v41 = vrot.slane %v194_v32, %v1195_v34 }
  0xb4   :  { %v1170_v39 = vpop.xlane.xlu0 %116  ;;  %v211_v7 = vmax.f32 %v1168_v38, 0.0  ;;  %v400_v43 = vsel %vm304_vm7, %v399_v18, %v395_v61 }
  0xb5   :  { %v195_v21 = vmax.f32 %v1170_v39, 0.0  ;;  %v305_v44 = vsel %vm304_vm7, %v303_v41, %v298_v62 }
  0xb6   :  { %v404_v63 = vrot.slane %v211_v7, %v1198_v37 }
  0xb7   :  { %v1185_v25 = vpop.xlane.xlu1 %167  ;;  %v310_v34 = vrot.slane %v195_v21, %v1198_v37 }
  0xb8   :  { %v1187_v15 = vpop.xlane.xlu0 %119  ;;  %v212_v55 = vmax.f32 %v1185_v25, 0.0 }
  0xb9   :  { %v196_v24 = vmax.f32 %v1187_v15, 0.0  ;;  %v312_v16 = vsel %vm311_vm8, %v310_v34, %v305_v44 }
  0xbb   :  { %v1215_v4 = vpop.xlane.xlu1 %170  ;;  %v317_v60 = vrot.slane %v196_v24, %v1201_v54 }
  0xbc   :  { %v1217_v0 = vpop.xlane.xlu0 %122  ;;  %v213_v31 = vmax.f32 %v1215_v4, 0.0 }
  0xbd   :  { %v197_v38 = vmax.f32 %v1217_v0, 0.0  ;;  %v409_v0 = vrot.slane %v212_v55, %v1201_v54  ;;  %v405_v54 = vsel %vm311_vm8, %v404_v63, %v400_v43 }
  0xbf   :  { %v1233_v47 = vpop.xlane.xlu1 %173 }
  0xc0   :  { %v1235_v8 = vpop.xlane.xlu0 %125  ;;  %v214_v25 = vmax.f32 %v1233_v47, 0.0  ;;  %v414_v47 = vrot.slane %v213_v31, %v1206_v14 }
  0xc1   :  { %v198_v15 = vmax.f32 %v1235_v8, 0.0  ;;  %v324_v8 = vrot.slane %v197_v38, %v1206_v14  ;;  %v319_v14 = vsel %vm318_vm9, %v317_v60, %v312_v16 }
  0xc2   :  { %v419_v37 = vrot.slane %v214_v25, %v1209_v48 }
  0xc3   :  { %v177_v49 = vpop.xlane.xlu1 %176  ;;  %v331_v45 = vrot.slane %v198_v15, %v1209_v48  ;;  %v326_v59 = vsel %vm325_vm10, %v324_v8, %v319_v14 }
  0xc4   :  { %v129_v50 = vpop.xlane.xlu0 %128  ;;  %v215_v3 = vmax.f32 %v177_v49, 0.0  ;;  %v410_v49 = vsel %vm318_vm9, %v409_v0, %v405_v54 }
  0xc5   :  { %v199_v4 = vmax.f32 %v129_v50, 0.0  ;;  %v415_v48 = vsel %vm325_vm10, %v414_v47, %v410_v49  ;;  %v333_v7 = vsel %vm332_vm11, %v331_v45, %v326_v59  ;;  %v572_v47 = vsub.s32 1, %v1163_v28 }
  0xc6   :  { %v424_v19 = vrot.slane %v215_v3, %v1222_v20 }
  0xc7   :  { %v180_v39 = vpop.xlane.xlu1 %179  ;;  %v338_v32 = vrot.slane %v199_v4, %v1222_v20  ;;  %v420_v20 = vsel %vm332_vm11, %v419_v37, %v415_v48 }
  0xc8   :  { %v132_v57 = vpop.xlane.xlu0 %131  ;;  %v216_v22 = vmax.f32 %v180_v39, 0.0  ;;  %v425_v58 = vsel %vm339_vm12, %v424_v19, %v420_v20 }
  0xc9   :  { %v200_v11 = vmax.f32 %v132_v57, 0.0 }
  0xca   :  { %v429_v50 = vrot.slane %v216_v22, %v1225_v56  ;;  %v505_v22 = vsub.s32 0, %v1163_v28 }
  0xcb   :  { %v183_v33 = vpop.xlane.xlu1 %182  ;;  %v345_v42 = vrot.slane %v200_v11, %v1225_v56  ;;  %v340_v56 = vsel %vm339_vm12, %v338_v32, %v333_v7 }
  0xcc   :  { %v135_v52 = vpop.xlane.xlu0 %134  ;;  %v217_v46 = vmax.f32 %v183_v33, 0.0  ;;  %v430_v55 = vsel %vm346_vm13, %v429_v50, %v425_v58 }
  0xcd   :  { %v201_v40 = vmax.f32 %v135_v52, 0.0  ;;  %v347_v24 = vsel %vm346_vm13, %v345_v42, %v340_v56 }
  0xce   :  { %v434_v51 = vrot.slane %v217_v46, %v1240_v12 }
  0xcf   :  { %v352_v36 = vrot.slane %v201_v40, %v1240_v12  ;;  %v186_v53 = vpop.xlane.xlu1 %185 }
  0xd0   :  { %v138_v30 = vpop.xlane.xlu0 %137  ;;  %v218_v21 = vmax.f32 %v186_v53, 0.0  ;;  %v435_v31 = vsel %vm353_vm14, %v434_v51, %v430_v55 }
  0xd1   :  { %v202_v26 = vmax.f32 %v138_v30, 0.0  ;;  %v354_v41 = vsel %vm353_vm14, %v352_v36, %v347_v24 }
  0xd2   :  { %v439_v12 = vrot.slane %v218_v21, %v1243_v13 }
  0xd3   :  { %v359_v18 = vrot.slane %v202_v26, %v1243_v13  ;;  %v455_v13 = vpop.permute.xlu1 %454 }
  0xd4   :  { %v440_v39 = vsel %vm360_vm15, %v439_v12, %v435_v31  ;;  %vm456_vm3 = vcmp.lt.s32.totalorder %v1161_v27, %v455_v13 }
  0xd5   :  { %v361_v38 = vsel %vm360_vm15, %v359_v18, %v354_v41 }
  0xd6   :  { %v442_v57 = vsel %vm441_vm1, %v440_v39, %v361_v38 }
  0xd7   :  { %v446_v61 = vsel %vm445_vm2, %v442_v57, -inf  ;;  %444 = vst [vmem:[#allocation4] sm:$0x3] %v442_v57 }
  0xd8   :  { %447 = vmax.xlane.f32.xlu0 %v446_v61 }
  0xde   :  { %v450_v15 = vld [vmem:[#allocation4] sm:$0x3] }
 0x165   :  { %v448_v62 = vpop.xlane.xlu0 %447 }
 0x166   :  { %v449_v25 = vmax.f32 %v448_v62, 0.0 }
 0x168   :  { %v457_v63 = vsub.f32 %v450_v15, %v449_v25 }
 0x16a   :  { %v458_v34 = vmul.f32 1.442695, %v457_v63 }
 0x16c   :  { %785 = vpow2.f32 %v458_v34 }
 0x176   :  { %v786_v3 = vpop.eup %785 }
 0x177   :  { %v460_v4 = vsel %vm456_vm3, %v786_v3, 0.0 }
 0x178   :  { %v462_v0 = vsel %vm445_vm2, %v460_v4, 0.0  ;;  %461 = vst [vmem:[#allocation4] sm:$0x3] %v460_v4 }
 0x179   :  { %463 = vadd.xlane.f32.xlu0 %v462_v0 }
 0x17f   :  { %v468_v43 = vld [vmem:[#allocation4] sm:$0x3] }
 0x206   :  { %v464_v60 = vpop.xlane.xlu0 %463 }
 0x207   :  { %787 = vrcp.f32 %v464_v60 }
 0x211   :  { %v788_v11 = vpop.eup %787 }
 0x212   :  { %v469_v44 = vmul.f32 %v788_v11, %v468_v43 }
 0x214   :  { %v506_v8 = vrot.slane %v469_v44, %v505_v22  ;;  %470 = vst [vmem:[#allocation4] sm:$0x3] %v469_v44  ;;  %v573_v27 = vrot.slane %v469_v44, %v572_v47 }
 0x216   :  { %512 = vbcast.lane.b32.xlu1 %v506_v8, 264  ;;  %508 = vbcast.lane.b32.xlu0 %v506_v8, 256 }
 0x21a   :  { %575 = vbcast.lane.b32.xlu1 %v573_v27, 256  ;;  %583 = vbcast.lane.b32.xlu0 %v573_v27, 272 }
 0x21e   :  { %579 = vbcast.lane.b32.xlu1 %v573_v27, 264  ;;  %587 = vbcast.lane.b32.xlu0 %v573_v27, 280 }
 0x222   :  { %516 = vbcast.lane.b32.xlu1 %v506_v8, 272  ;;  %591 = vbcast.lane.b32.xlu0 %v573_v27, 288 }
 0x226   :  { %520 = vbcast.lane.b32.xlu1 %v506_v8, 280  ;;  %595 = vbcast.lane.b32.xlu0 %v573_v27, 296 }
 0x22a   :  { %524 = vbcast.lane.b32.xlu1 %v506_v8, 288  ;;  %599 = vbcast.lane.b32.xlu0 %v573_v27, 304 }
 0x22e   :  { %528 = vbcast.lane.b32.xlu1 %v506_v8, 296  ;;  %603 = vbcast.lane.b32.xlu0 %v573_v27, 312 }
 0x232   :  { %532 = vbcast.lane.b32.xlu1 %v506_v8, 304  ;;  %607 = vbcast.lane.b32.xlu0 %v573_v27, 320 }
 0x236   :  { %536 = vbcast.lane.b32.xlu1 %v506_v8, 312  ;;  %611 = vbcast.lane.b32.xlu0 %v573_v27, 328 }
 0x23a   :  { %540 = vbcast.lane.b32.xlu1 %v506_v8, 320  ;;  %615 = vbcast.lane.b32.xlu0 %v573_v27, 336 }
 0x23e   :  { %544 = vbcast.lane.b32.xlu1 %v506_v8, 328  ;;  %619 = vbcast.lane.b32.xlu0 %v573_v27, 344 }
 0x242   :  { %548 = vbcast.lane.b32.xlu1 %v506_v8, 336  ;;  %623 = vbcast.lane.b32.xlu0 %v573_v27, 352 }
 0x246   :  { %552 = vbcast.lane.b32.xlu1 %v506_v8, 344  ;;  %627 = vbcast.lane.b32.xlu0 %v573_v27, 360 }
 0x24a   :  { %556 = vbcast.lane.b32.xlu1 %v506_v8, 352  ;;  %631 = vbcast.lane.b32.xlu0 %v573_v27, 368 }
 0x24e   :  { %560 = vbcast.lane.b32.xlu1 %v506_v8, 360  ;;  %635 = vbcast.lane.b32.xlu0 %v573_v27, 376 }
 0x252   :  { %564 = vbcast.lane.b32.xlu1 %v506_v8, 368 }
 0x256   :  { %568 = vbcast.lane.b32.xlu1 %v506_v8, 376 }
 0x257   :  { %800 = shalt.err (!%p797_p4)
}
 0x258   :  { %s801_s5 = scalar_lea.hbm %s1400_s4, 32 }
 0x259   :  { %p802_p5 = scmp.ne.s32.totalorder %s1400_s4, %s801_s5  ;;  %p805_p6 = scmp.lt.u32.totalorder %s801_s5, %s1400_s4 }
 0x25b   :  { %p807_p7 = pnand %p805_p6, %p802_p5 }
 0x25d   :  { %810 = shalt.err (!%p807_p7)
}
 0x25e   :  { %770 = dma.vmem_to_hbm [thread:$0]  %s768_s27, 32, %s1400_s4, [#allocation5]   ;;  %v1445_v57 = vld [vmem:[#allocation8_spill] sm:$0xff]  ;;  %v1449_v22 = vld [vmem:[#allocation10_spill] sm:$0xff]  ;;  %vm749_vm4 = vcmask 254976  }
 0x25f   :  { %v1450_v44 = vld [vmem:[#allocation16_spill] sm:$0xff]  ;;  %s839_s4 = smov [#allocation2]  }
 0x260   :  { %s757_s12 = sshll.u32 %s839_s4, 4  ;;  %s758_s12 = int_to_ptr.vmem [resolvable:$true] %s757_s12 }
 0x261   :  { %s811_s13 = scalar_lea.vmem %s758_s12, 32  ;;  %p816_p9 = scmp.lt.s32.totalorder %s758_s12, %s758_s12 }
 0x262   :  { %p812_p8 = scmp.ne.s32.totalorder %s758_s12, %s811_s13  ;;  %p817_p10 = scmp.lt.s32.totalorder %s811_s13, %s811_s13 }
 0x264   :  { %p818_p11 = por %p817_p10, %p816_p9 }
 0x266   :  { %p819_p12 = pnand %p818_p11, %p812_p8 }
 0x288   :  { %v513_v28 = vpop.permute.xlu1 %512  ;;  %v509_v33 = vpop.permute.xlu0 %508 }
 0x289   :  { %v638_v58 = vmul.f32 %v513_v28, %v892_v6 }
 0x28b   :  { %v670_v31 = vsel %vm90_vm0, %v638_v58, 0.0 }
 0x28c   :  { %v576_v52 = vpop.permute.xlu1 %575  ;;  %v584_v37 = vpop.permute.xlu0 %583 }
 0x28d   :  { %v653_v49 = vmul.f32 %v576_v52, %v873_v1  ;;  %v655_v59 = vmul.f32 %v584_v37, %v901_v9  ;;  %v637_v9 = vmul.f32 %v509_v33, %v878_v2  ;;  %v1446_v2 = vld [vmem:[#allocation12_spill] sm:$0xff]  ;;  %v1451_v33 = vld [vmem:[#allocation11_spill] sm:$0xff] }
 0x28f   :  { %v706_v48 = vsel %vm90_vm0, %v653_v49, 0.0  ;;  %v709_v30 = vsel %vm90_vm0, %v655_v59, 0.0  ;;  %v669_v6 = vsel %vm90_vm0, %v637_v9, 0.0  ;;  %v1453_v49 = vld [vmem:[#allocation13_spill] sm:$0xff] }
 0x290   :  { %v580_v45 = vpop.permute.xlu1 %579  ;;  %v588_v46 = vpop.permute.xlu0 %587  ;;  %v671_v13 = vadd.f32 %v670_v31, %v669_v6 }
 0x291   :  { %v654_v32 = vmul.f32 %v580_v45, %v887_v5  ;;  %v656_v20 = vmul.f32 %v588_v46, %v919_v17  ;;  %v1452_v45 = vld [vmem:[#allocation18_spill] sm:$0xff] }
 0x293   :  { %v707_v42 = vsel %vm90_vm0, %v654_v32, 0.0  ;;  %v711_v1 = vsel %vm90_vm0, %v656_v20, 0.0 }
 0x294   :  { %v517_v40 = vpop.permute.xlu1 %516  ;;  %v592_v54 = vpop.permute.xlu0 %591  ;;  %v708_v51 = vadd.f32 %v707_v42, %v706_v48  ;;  %v1454_v42 = vld [vmem:[#allocation20_spill] sm:$0xff] }
 0x295   :  { %v657_v26 = vmul.f32 %v592_v54, %v935_v23  ;;  %v639_v18 = vmul.f32 %v517_v40, %v906_v10  ;;  %v1447_v10 = vld [vmem:[#allocation9_spill] sm:$0xff] }
 0x296   :  { %v710_v7 = vadd.f32 %v709_v30, %v708_v51 }
 0x297   :  { %v713_v17 = vsel %vm90_vm0, %v657_v26, 0.0 }
 0x298   :  { %v521_v16 = vpop.permute.xlu1 %520  ;;  %v596_v19 = vpop.permute.xlu0 %595  ;;  %v712_v56 = vadd.f32 %v711_v1, %v710_v7  ;;  %v1456_v7 = vld [vmem:[#allocation22_spill] sm:$0xff] }
 0x299   :  { %v658_v12 = vmul.f32 %v596_v19, %v951_v29  ;;  %v640_v61 = vmul.f32 %v521_v16, %v1445_v57  ;;  %v672_v29 = vsel %vm90_vm0, %v639_v18, 0.0 }
 0x29a   :  { %v714_v38 = vadd.f32 %v713_v17, %v712_v56  ;;  %v673_v8 = vadd.f32 %v672_v29, %v671_v13 }
 0x29b   :  { %v715_v62 = vsel %vm90_vm0, %v658_v12, 0.0  ;;  %v674_v60 = vsel %vm90_vm0, %v640_v61, 0.0  ;;  %v1458_v12 = vld [vmem:[#allocation24_spill] sm:$0xff] }
 0x29c   :  { %v525_v14 = vpop.permute.xlu1 %524  ;;  %v600_v50 = vpop.permute.xlu0 %599  ;;  %v716_v3 = vadd.f32 %v715_v62, %v714_v38  ;;  %v675_v40 = vadd.f32 %v674_v60, %v673_v8  ;;  %v1459_v38 = vld [vmem:[#allocation19_spill] sm:$0xff] }
 0x29d   :  { %v659_v41 = vmul.f32 %v600_v50, %v967_v35  ;;  %v641_v15 = vmul.f32 %v525_v14, %v1447_v10  ;;  %v1448_v35 = vld [vmem:[#allocation14_spill] sm:$0xff] }
 0x29f   :  { %v717_v63 = vsel %vm90_vm0, %v659_v41, 0.0  ;;  %v676_v28 = vsel %vm90_vm0, %v641_v15, 0.0  ;;  %v1461_v15 = vld [vmem:[#allocation26_spill] sm:$0xff] }
 0x2a0   :  { %v529_v36 = vpop.permute.xlu1 %528  ;;  %v604_v53 = vpop.permute.xlu0 %603  ;;  %v718_v27 = vadd.f32 %v717_v63, %v716_v3  ;;  %v677_v59 = vadd.f32 %v676_v28, %v675_v40  ;;  %v1462_v3 = vld [vmem:[#allocation23_spill] sm:$0xff] }
 0x2a1   :  { %v660_v25 = vmul.f32 %v604_v53, %v1446_v2  ;;  %v642_v11 = vmul.f32 %v529_v36, %v1449_v22  ;;  %v1455_v53 = vld [vmem:[#allocation15_spill] sm:$0xff] }
 0x2a3   :  { %v719_v43 = vsel %vm90_vm0, %v660_v25, 0.0  ;;  %v678_v32 = vsel %vm90_vm0, %v642_v11, 0.0  ;;  %v1460_v25 = vld [vmem:[#allocation21_spill] sm:$0xff] }
 0x2a4   :  { %v533_v21 = vpop.permute.xlu1 %532  ;;  %v608_v5 = vpop.permute.xlu0 %607  ;;  %v720_v54 = vadd.f32 %v719_v43, %v718_v27  ;;  %v1464_v27 = vld [vmem:[#allocation28_spill] sm:$0xff] }
 0x2a5   :  { %v661_v34 = vmul.f32 %v608_v5, %v1448_v35  ;;  %v643_v52 = vmul.f32 %v533_v21, %v1451_v33  ;;  %v679_v5 = vadd.f32 %v678_v32, %v677_v59 }
 0x2a7   :  { %v721_v37 = vsel %vm90_vm0, %v661_v34, 0.0  ;;  %v680_v36 = vsel %vm90_vm0, %v643_v52, 0.0 }
 0x2a8   :  { %v537_v55 = vpop.permute.xlu1 %536  ;;  %v612_v24 = vpop.permute.xlu0 %611  ;;  %v722_v51 = vadd.f32 %v721_v37, %v720_v54  ;;  %v681_v17 = vadd.f32 %v680_v36, %v679_v5 }
 0x2a9   :  { %v662_v47 = vmul.f32 %v612_v24, %v1450_v44  ;;  %v644_v14 = vmul.f32 %v537_v55, %v1453_v49  ;;  %v1457_v55 = vld [vmem:[#allocation17_spill] sm:$0xff] }
 0x2ab   :  { %v723_v50 = vsel %vm90_vm0, %v662_v47, 0.0  ;;  %v682_v56 = vsel %vm90_vm0, %v644_v14, 0.0  ;;  %v1463_v47 = vld [vmem:[#allocation25_spill] sm:$0xff] }
 0x2ac   :  { %v541_v39 = vpop.permute.xlu1 %540  ;;  %v616_v23 = vpop.permute.xlu0 %615  ;;  %v724_v1 = vadd.f32 %v723_v50, %v722_v51  ;;  %v683_v6 = vadd.f32 %v682_v56, %v681_v17  ;;  %v1466_v51 = vld [vmem:[#allocation29_spill] sm:$0xff] }
 0x2ad   :  { %v663_v46 = vmul.f32 %v616_v23, %v1452_v45  ;;  %v645_v30 = vmul.f32 %v541_v39, %v1455_v53 }
 0x2af   :  { %v725_v20 = vsel %vm90_vm0, %v663_v46, 0.0  ;;  %v684_v31 = vsel %vm90_vm0, %v645_v30, 0.0 }
 0x2b0   :  { %v545_v4 = vpop.permute.xlu1 %544  ;;  %v620_v0 = vpop.permute.xlu0 %619  ;;  %v726_v41 = vadd.f32 %v725_v20, %v724_v1  ;;  %v685_v35 = vadd.f32 %v684_v31, %v683_v6 }
 0x2b1   :  { %v664_v48 = vmul.f32 %v620_v0, %v1454_v42  ;;  %v646_v24 = vmul.f32 %v545_v4, %v1457_v55 }
 0x2b3   :  { %v727_v9 = vsel %vm90_vm0, %v664_v48, 0.0  ;;  %v686_v2 = vsel %vm90_vm0, %v646_v24, 0.0 }
 0x2b4   :  { %v549_v16 = vpop.permute.xlu1 %548  ;;  %v624_v19 = vpop.permute.xlu0 %623  ;;  %v728_v57 = vadd.f32 %v727_v9, %v726_v41  ;;  %v687_v60 = vadd.f32 %v686_v2, %v685_v35 }
 0x2b5   :  { %v665_v21 = vmul.f32 %v624_v19, %v1456_v7  ;;  %v647_v39 = vmul.f32 %v549_v16, %v1459_v38  ;;  %v1465_v19 = vld [vmem:[#allocation27_spill] sm:$0xff] }
 0x2b7   :  { %v729_v23 = vsel %vm90_vm0, %v665_v21, 0.0  ;;  %v688_v13 = vsel %vm90_vm0, %v647_v39, 0.0 }
 0x2b8   :  { %v553_v26 = vpop.permute.xlu1 %552  ;;  %v628_v58 = vpop.permute.xlu0 %627  ;;  %v730_v34 = vadd.f32 %v729_v23, %v728_v57  ;;  %v689_v33 = vadd.f32 %v688_v13, %v687_v60 }
 0x2b9   :  { %v666_v18 = vmul.f32 %v628_v58, %v1458_v12  ;;  %v648_v29 = vmul.f32 %v553_v26, %v1460_v25 }
 0x2bb   :  { %v731_v10 = vsel %vm90_vm0, %v666_v18, 0.0  ;;  %v690_v44 = vsel %vm90_vm0, %v648_v29, 0.0 }
 0x2bc   :  { %v557_v61 = vpop.permute.xlu1 %556  ;;  %v632_v62 = vpop.permute.xlu0 %631  ;;  %v732_v22 = vadd.f32 %v731_v10, %v730_v34  ;;  %v691_v46 = vadd.f32 %v690_v44, %v689_v33 }
 0x2bd   :  { %v667_v63 = vmul.f32 %v632_v62, %v1461_v15  ;;  %v649_v4 = vmul.f32 %v557_v61, %v1462_v3 }
 0x2bf   :  { %v733_v0 = vsel %vm90_vm0, %v667_v63, 0.0  ;;  %v692_v37 = vsel %vm90_vm0, %v649_v4, 0.0 }
 0x2c0   :  { %v561_v11 = vpop.permute.xlu1 %560  ;;  %v636_v43 = vpop.permute.xlu0 %635  ;;  %v734_v52 = vadd.f32 %v733_v0, %v732_v22  ;;  %v693_v49 = vadd.f32 %v692_v37, %v691_v46 }
 0x2c1   :  { %v650_v8 = vmul.f32 %v561_v11, %v1463_v47  ;;  %v668_v28 = vmul.f32 %v636_v43, %v1464_v27 }
 0x2c3   :  { %v735_v45 = vsel %vm90_vm0, %v668_v28, 0.0  ;;  %v694_v16 = vsel %vm90_vm0, %v650_v8, 0.0 }
 0x2c4   :  { %v736_v40 = vadd.f32 %v735_v45, %v734_v52  ;;  %v565_v54 = vpop.permute.xlu1 %564  ;;  %v695_v42 = vadd.f32 %v694_v16, %v693_v49 }
 0x2c5   :  { %v651_v32 = vmul.f32 %v565_v54, %v1465_v19 }
 0x2c6   :  { %v737_v14 = vrot.slane %v736_v40, 4 }
 0x2c7   :  { %v696_v50 = vsel %vm90_vm0, %v651_v32, 0.0 }
 0x2c8   :  { %v738_v48 = vadd.f32 %v737_v14, %v736_v40  ;;  %v569_v59 = vpop.permute.xlu1 %568  ;;  %v697_v53 = vadd.f32 %v696_v50, %v695_v42 }
 0x2c9   :  { %v652_v36 = vmul.f32 %v569_v59, %v1466_v51 }
 0x2ca   :  { %v739_v20 = vrot.slane %v738_v48, 2 }
 0x2cb   :  { %v698_v30 = vsel %vm90_vm0, %v652_v36, 0.0 }
 0x2cc   :  { %v699_v7 = vadd.f32 %v698_v30, %v697_v53  ;;  %v740_v5 = vadd.f32 %v739_v20, %v738_v48 }
 0x2ce   :  { %v700_v21 = vrot.slane %v699_v7, 4  ;;  %v741_v56 = vrot.slane %v740_v5, 1 }
 0x2d0   :  { %v701_v1 = vadd.f32 %v700_v21, %v699_v7  ;;  %v742_v9 = vadd.f32 %v741_v56, %v740_v5 }
 0x2d2   :  { %v702_v26 = vrot.slane %v701_v1, 2 }
 0x2d4   :  { %v703_v58 = vadd.f32 %v702_v26, %v701_v1 }
 0x2d6   :  { %v704_v55 = vrot.slane %v703_v58, 1 }
 0x2d8   :  { %v705_v24 = vadd.f32 %v704_v55, %v703_v58 }
 0x2da   :  { %v747_v12 = vsel %vm441_vm1, %v742_v9, %v705_v24 }
 0x2db   :  { %750 = vst.msk [vmem:[#allocation2] sm:$0x3] %vm749_vm4, %v747_v12 }
 0x2dc   :  { %822 = shalt.err (!%p819_p12)
}
 0x2dd   :  { %s823_s16 = scalar_lea.hbm %s1399_s3, 32 }
 0x2de   :  { %p824_p13 = scmp.ne.s32.totalorder %s1399_s3, %s823_s16  ;;  %p827_p0 = scmp.lt.u32.totalorder %s823_s16, %s1399_s3 }
 0x2e0   :  { %p829_p1 = pnand %p827_p0, %p824_p13 }
 0x2e2   :  { %832 = shalt.err (!%p829_p1)
}
 0x2e3   :  { %760 = dma.vmem_to_hbm [thread:$0]  %s758_s12, 32, %s1399_s3, [#allocation3]  }
 0x2e4   :  { %833 = dma.done.wait [#allocation3], 32  }
 0x2e5   :  { %834 = vsyncadd [#allocation3], 4294967264 }
 0x2e6   :  { %835 = dma.done.wait [#allocation5], 32  }
 0x2e7   :  { %836 = vsyncadd [#allocation5], 4294967264 }
 0x2e8   :  { %777 = vsyncpa [#allocation3], 1 }
 0x2e9   :  { %778 = vsyncpa [#allocation5], 1 }

</bundles_post_ra>
